<compile_context>
chip_gen: v6e
topology: v6e:2x2x1
jax: 0.10.0
libtpu: 0.0.40
codegen_flags: <defaults>
</compile_context>

<pallas_src>
import functools

import jax
import jax.numpy as jnp
from jax.experimental import pallas as pl
from jax.experimental.pallas import tpu as pltpu

HIDDEN = 256


# --------------------------------------------------------------------------- #
# Hardware / budget helpers
# --------------------------------------------------------------------------- #
def _tpu_info():
    """(vmem_capacity_bytes, tensorcores_per_chip) with safe fallbacks."""
    vmem_cap = 64 * 1024 * 1024          # conservative (v7x-sized) fallback
    n_cores = 1
    try:
        info = pltpu.get_tpu_info()
        cap = getattr(info, "vmem_capacity_bytes", None)
        if cap:
            vmem_cap = int(cap)
        for attr in ("num_cores", "core_count", "num_tensorcores",
                     "tensorcore_count", "tensorcores_per_chip"):
            val = getattr(info, attr, None)
            if val:
                n_cores = int(val)
                break
    except Exception:
        pass
    return vmem_cap, n_cores


def _x_budget(vmem_cap):
    # Budget for the double-buffered x tiles: ~35% of physical VMEM
    # (=> ~22 MiB on v7x's 64 MiB, ~45 MiB on v5e/v6e's 128 MiB), clamped.
    return int(min(48 << 20, max(8 << 20, int(0.35 * vmem_cap))))


def _vmem_limit(est_bytes, vmem_cap):
    limit = max(int(1.5 * est_bytes), est_bytes + (4 << 20), 8 << 20)
    return int(min(limit, (vmem_cap * 4) // 5))


def _round_up(x, m):
    return ((x + m - 1) // m) * m


def _pick_hw_tile(hw128, t_b, c, itemsize, x_budget_bytes):
    """Largest multiple-of-128 lane tile whose double-buffered x footprint fits."""
    bytes_per_lane = max(1, t_b * c * itemsize)
    max_lanes = (x_budget_bytes // (2 * bytes_per_lane)) // 128 * 128
    max_lanes = max(128, max_lanes)
    if hw128 <= max_lanes:
        return hw128
    # Prefer an exact multiple-of-128 divisor of hw128 (no zero-pad waste) if
    # one exists within 2x of the byte cap; otherwise take the cap and let the
    # wrapper zero-pad the last tile.
    n = hw128 // 128
    lo = max(1, max_lanes // 256)
    for d in range(max_lanes // 128, lo - 1, -1):
        if n % d == 0:
            return d * 128
    return max_lanes


# --------------------------------------------------------------------------- #
# Kernels
# --------------------------------------------------------------------------- #
def holistic_head_kernel(x_ref, w1_ref, b1_ref, w2_ref, b2_ref, o_ref, acc_ref,
                         *, inv_hw):
    # x_ref : (T_B, C, T_HW)   w1_ref: (C, H)   b1_ref: (1, H)
    # w2_ref: (1, H)           b2_ref: (1,) in SMEM
    # o_ref : (T_B, 1)         acc_ref: (T_B, C) f32 scratch
    k = pl.program_id(1)

    @pl.when(k == 0)
    def _init():
        acc_ref[...] = jnp.zeros_like(acc_ref)

    # Steady state: partial sum over the lane (spatial) axis of this tile.
    # The lane reduce runs on the XLU, idle in this DMA-bound loop; the divide
    # by HW is deferred to the epilogue.  Upcast keeps bf16 inputs exact-enough.
    x = x_ref[...].astype(jnp.float32)                    # (T_B, C, T_HW)
    acc_ref[...] += jnp.sum(x, axis=-1)                   # (T_B, C)

    @pl.when(k == pl.num_programs(1) - 1)
    def _finalize():
        pooled = acc_ref[...] * inv_hw                    # mean over true HW
        # fc1 + ReLU (dropout with p=0 is the identity)
        h = jnp.dot(pooled, w1_ref[...],
                    preferred_element_type=jnp.float32) + b1_ref[...]
        h = jnp.maximum(h, 0.0)                           # (T_B, H)
        # fc2 on the VPU: elementwise mul + lane reduce (no 1-column MXU pass)
        out = jnp.sum(h * w2_ref[...], axis=-1, keepdims=True) + b2_ref[0]
        o_ref[...] = jnp.abs(out).astype(o_ref.dtype)     # (T_B, 1)


def _pool_partial_kernel(x_ref, psum_ref, acc_ref):
    # Parallel-HW pooling: grid = (num_splits ["parallel"], tiles_per_split).
    # Each split writes its own (1, B, C) partial sum; combine + fc in wrapper.
    k = pl.program_id(1)

    @pl.when(k == 0)
    def _init():
        acc_ref[...] = jnp.zeros_like(acc_ref)

    acc_ref[...] += jnp.sum(x_ref[...].astype(jnp.float32), axis=-1)

    @pl.when(k == pl.num_programs(1) - 1)
    def _finalize():
        psum_ref[...] = acc_ref[...][None, :, :]


# --------------------------------------------------------------------------- #
# Wrappers
# --------------------------------------------------------------------------- #
def _holistic_head_fused(x_flat, w1, b1, w2, b2, hw_true, t_b, *,
                         x_budget_bytes, vmem_cap):
    B, C, HW = x_flat.shape
    hidden = w1.shape[1]
    itemsize = jnp.dtype(x_flat.dtype).itemsize

    hw128 = _round_up(HW, 128)
    t_hw = _pick_hw_tile(hw128, t_b, C, itemsize, x_budget_bytes)
    hw_pad = _round_up(HW, t_hw)
    if hw_pad != HW:
        # Zero padding leaves the sum unchanged; we divide by the true HW.
        x_flat = jnp.pad(x_flat, ((0, 0), (0, 0), (0, hw_pad - HW)))
    grid = (B // t_b, hw_pad // t_hw)

    b1_2d = b1.reshape(1, hidden)
    w2_2d = w2.reshape(1, hidden)         # fc2 weight as a lane-resident row
    b2_1d = b2.reshape(1)

    x_bytes = 2 * t_b * C * t_hw * itemsize
    w_bytes = 2 * (C * hidden + 2 * 8 * max(hidden, 128)) * 4
    acc_bytes = max(t_b, 8) * max(C, 128) * 4
    out_bytes = 2 * max(t_b, 8) * 128 * 4
    est = x_bytes + w_bytes + acc_bytes + out_bytes

    kernel = functools.partial(holistic_head_kernel, inv_hw=1.0 / float(hw_true))

    return pl.pallas_call(
        kernel,
        out_shape=jax.ShapeDtypeStruct((B, 1), jnp.float32),
        grid_spec=pltpu.PrefetchScalarGridSpec(
            num_scalar_prefetch=0,
            grid=grid,
            in_specs=[
                # x: tiled over (batch block, spatial tile); HW stays on lanes.
                pl.BlockSpec((t_b, C, t_hw), lambda b, k: (b, 0, k)),
                # Weights/biases: constant index_map -> DMA'd once, resident.
                pl.BlockSpec((C, hidden), lambda b, k: (0, 0)),
                pl.BlockSpec((1, hidden), lambda b, k: (0, 0)),
                pl.BlockSpec((1, hidden), lambda b, k: (0, 0)),
                # Scalar fc2 bias in SMEM.
                pl.BlockSpec(memory_space=pltpu.MemorySpace.SMEM),
            ],
            out_specs=pl.BlockSpec((t_b, 1), lambda b, k: (b, 0)),
            scratch_shapes=[pltpu.VMEM((t_b, C), jnp.float32)],
        ),
        compiler_params=pltpu.CompilerParams(
            dimension_semantics=("parallel", "arbitrary"),
            vmem_limit_bytes=_vmem_limit(est, vmem_cap),
        ),
        cost_estimate=pl.CostEstimate(
            flops=B * C * hw_pad + 2 * B * C * hidden + 2 * B * hidden,
            transcendentals=0,
            bytes_accessed=B * C * hw_pad * itemsize
                           + (C * hidden + 2 * hidden + 1) * 4 + B * 4,
        ),
    )(x_flat, w1, b1_2d, w2_2d, b2_1d)


def _holistic_head_split_hw(x_flat, w1, b1, w2, b2, hw_true, *, num_splits,
                            x_budget_bytes, vmem_cap):
    """Multi-TensorCore path when the batch axis cannot be split: split the HW
    reduction across cores; combine partial sums + tiny fc epilogue in JAX."""
    B, C, HW = x_flat.shape
    itemsize = jnp.dtype(x_flat.dtype).itemsize

    hw128 = _round_up(HW, 128)
    t_hw = _pick_hw_tile(hw128, B, C, itemsize, x_budget_bytes)
    # Ensure every split covers at least one tile of real data.
    per_split_max = max(128, (hw128 // num_splits) // 128 * 128)
    t_hw = min(t_hw, per_split_max)
    hw_pad = _round_up(HW, num_splits * t_hw)
    if hw_pad != HW:
        x_flat = jnp.pad(x_flat, ((0, 0), (0, 0), (0, hw_pad - HW)))
    k_per_split = hw_pad // t_hw // num_splits

    def x_index_map(p, k):
        return (0, 0, p * k_per_split + k)

    x_bytes = 2 * B * C * t_hw * itemsize
    est = x_bytes + 3 * max(B, 8) * max(C, 128) * 4

    psum = pl.pallas_call(
        _pool_partial_kernel,
        out_shape=jax.ShapeDtypeStruct((num_splits, B, C), jnp.float32),
        grid_spec=pltpu.PrefetchScalarGridSpec(
            num_scalar_prefetch=0,
            grid=(num_splits, k_per_split),
            in_specs=[pl.BlockSpec((B, C, t_hw), x_index_map)],
            out_specs=pl.BlockSpec((1, B, C), lambda p, k: (p, 0, 0)),
            scratch_shapes=[pltpu.VMEM((B, C), jnp.float32)],
        ),
        compiler_params=pltpu.CompilerParams(
            dimension_semantics=("parallel", "arbitrary"),
            vmem_limit_bytes=_vmem_limit(est, vmem_cap),
        ),
        cost_estimate=pl.CostEstimate(
            flops=B * C * hw_pad,
            transcendentals=0,
            bytes_accessed=B * C * hw_pad * itemsize + num_splits * B * C * 4,
        ),
    )(x_flat)

    pooled = jnp.sum(psum, axis=0) * (1.0 / float(hw_true))        # (B, C)
    h = jnp.maximum(pooled @ w1 + b1.reshape(1, -1), 0.0)          # (B, H)
    out = jnp.abs(h @ w2.reshape(-1, 1) + b2.reshape(1, -1))       # (B, 1)
    return out.astype(jnp.float32)


def holistic_head(x_nchw, w1, b1, w2, b2, *, input_dtype=None):
    """x_nchw: (B, C, H, W). w1: (C, 256), b1: (256,), w2: (256, 1), b2: (1,).

    Returns (B, 1) float32.  Pass input_dtype=jnp.bfloat16 (or feed bf16
    upstream) to halve the dominant HBM read; accumulation stays f32.
    """
    B, C, H, W = x_nchw.shape
    HW = H * W
    x_flat = x_nchw.reshape(B, C, HW)
    if input_dtype is not None:
        x_flat = x_flat.astype(input_dtype)

    vmem_cap, n_cores = _tpu_info()
    x_budget = _x_budget(vmem_cap)

    w1f = w1.astype(jnp.float32)
    b1f = b1.astype(jnp.float32)
    w2f = w2.astype(jnp.float32)
    b2f = b2.astype(jnp.float32)

    # Only split the batch ("parallel") axis on multi-TensorCore chips, and only
    # when each block keeps >= 8 rows (no 1-row MXU passes / masked stores).
    t_b = B
    if n_cores >= 2 and B % 2 == 0 and (B // 2) % 8 == 0:
        t_b = B // 2

    if n_cores >= 2 and t_b == B and HW >= 2 * 128:
        # No usable batch split on a multi-core chip: parallel-split HW instead
        # so both TensorCores contribute HBM bandwidth to the pooling read.
        return _holistic_head_split_hw(
            x_flat, w1f, b1f, w2f, b2f, HW,
            num_splits=min(2, n_cores),
            x_budget_bytes=x_budget, vmem_cap=vmem_cap)

    return _holistic_head_fused(
        x_flat, w1f, b1f, w2f, b2f, HW, t_b,
        x_budget_bytes=x_budget, vmem_cap=vmem_cap)


# --------------------------------------------------------------------------- #
# Deterministic synthetic init matching the nn.Linear shapes
# --------------------------------------------------------------------------- #
def init_params(key, in_dim):
    k1, k2, k3, k4 = jax.random.split(key, 4)
    bound1 = 1.0 / (in_dim ** 0.5)
    w1 = jax.random.uniform(k1, (in_dim, HIDDEN), jnp.float32, -bound1, bound1)
    b1 = jax.random.uniform(k2, (HIDDEN,), jnp.float32, -bound1, bound1)
    bound2 = 1.0 / (HIDDEN ** 0.5)
    w2 = jax.random.uniform(k3, (HIDDEN, 1), jnp.float32, -bound2, bound2)
    b2 = jax.random.uniform(k4, (1,), jnp.float32, -bound2, bound2)
    return w1, b1, w2, b2


def _reference(x, w1, b1, w2, b2):
    pooled = jnp.mean(x, axis=(2, 3))
    h = jnp.maximum(pooled @ w1 + b1, 0.0)
    return jnp.abs(h @ w2 + b2)


if __name__ == "__main__":
    key = jax.random.PRNGKey(0)
    kx, kp, kx2 = jax.random.split(key, 3)

    # Small but non-trivial: B=2, C=32, HW=4096.
    B, C, H, W = 2, 32, 64, 64
    x = jax.random.normal(kx, (B, C, H, W), jnp.float32)
    w1, b1, w2, b2 = init_params(kp, C)
    ref = _reference(x, w1, b1, w2, b2)

    # 1) Default path (chip-aware fused kernel), f32 input.
    out = jax.block_until_ready(holistic_head(x, w1, b1, w2, b2))
    assert out.shape == (B, 1)
    assert jnp.allclose(out, ref, atol=1e-4, rtol=1e-4), (out, ref)

    # 2) bf16 input path (halves dominant HBM read; accumulation stays f32).
    out_bf16 = jax.block_until_ready(
        holistic_head(x, w1, b1, w2, b2, input_dtype=jnp.bfloat16))
    assert jnp.allclose(out_bf16, ref, atol=2e-2, rtol=2e-2), (out_bf16, ref)

    # 3) Explicitly exercise the parallel-HW-split (dual-TensorCore) path.
    vmem_cap, _ = _tpu_info()
    out_split = jax.block_until_ready(_holistic_head_split_hw(
        x.reshape(B, C, H * W), w1, b1, w2, b2, H * W,
        num_splits=2, x_budget_bytes=_x_budget(vmem_cap), vmem_cap=vmem_cap))
    assert jnp.allclose(out_split, ref, atol=1e-4, rtol=1e-4), (out_split, ref)

    # 4) Ragged spatial shape (HW not a multiple of 128): zero-pad path.
    H2, W2 = 17, 19
    x2 = jax.random.normal(kx2, (1, C, H2, W2), jnp.float32)
    ref2 = _reference(x2, w1, b1, w2, b2)
    out2 = jax.block_until_ready(holistic_head(x2, w1, b1, w2, b2))
    assert out2.shape == (1, 1)
    assert jnp.allclose(out2, ref2, atol=1e-4, rtol=1e-4), (out2, ref2)

    print("KERNEL_OK")
</pallas_src>

<mosaic_0001>
module attributes {stable_mosaic.version = 11 : i64} {
  func.func @holistic_head_kernel(%arg0: i32, %arg1: i32, %arg2: memref<2x32x4096xf32, #tpu.memory_space<vmem>>, %arg3: memref<32x256xf32, #tpu.memory_space<vmem>>, %arg4: memref<1x256xf32, #tpu.memory_space<vmem>>, %arg5: memref<1x256xf32, #tpu.memory_space<vmem>>, %arg6: memref<1xf32, #tpu.memory_space<smem>>, %arg7: memref<2x1xf32, #tpu.memory_space<vmem>>, %arg8: memref<2x32xf32, #tpu.memory_space<vmem>>) attributes {dimension_semantics = [#tpu.dimension_semantics<parallel>, #tpu.dimension_semantics<arbitrary>], iteration_bounds = array<i64: 1, 1>, scalar_prefetch = 0 : i64, scratch_operands = 1 : i64, tpu.core_type = #tpu.core_type<tc>, window_params = [{transform_indices = @transform_0, window_bounds = array<i64: 2, 32, 4096>}, {pipeline_mode = #tpu.pipeline_mode<synchronous>, transform_indices = @transform_1, window_bounds = array<i64: 32, 256>}, {pipeline_mode = #tpu.pipeline_mode<synchronous>, transform_indices = @transform_2, window_bounds = array<i64: 1, 256>}, {pipeline_mode = #tpu.pipeline_mode<synchronous>, transform_indices = @transform_3, window_bounds = array<i64: 1, 256>}, {transform_indices = @transform_4, window_bounds = array<i64: 1>}, {transform_indices = @transform_5, window_bounds = array<i64: 2, 1>}]} {
    %c0_i32 = arith.constant 0 : i32
    %0 = arith.cmpi eq, %arg1, %c0_i32 : i32
    %1 = arith.extui %0 : i1 to i32
    %c0_i32_0 = arith.constant 0 : i32
    %2 = arith.cmpi ne, %1, %c0_i32_0 : i32
    scf.if %2 {
      %cst_9 = arith.constant 0.000000e+00 : f32
      %11 = vector.broadcast %cst_9 : f32 to vector<2x32xf32>
      %c0_10 = arith.constant 0 : index
      %c0_11 = arith.constant 0 : index
      %12 = vector.load %arg8[%c0_10, %c0_11] : memref<2x32xf32, #tpu.memory_space<vmem>>, vector<2x32xf32>
      tpu.vector_store %arg8[%c0_10, %c0_11], %11 {strides = array<i32>} : memref<2x32xf32, #tpu.memory_space<vmem>>, vector<2x32xf32>,
    } else {
    }
    %c0 = arith.constant 0 : index
    %c0_1 = arith.constant 0 : index
    %c0_2 = arith.constant 0 : index
    %3 = vector.load %arg2[%c0, %c0_1, %c0_2] : memref<2x32x4096xf32, #tpu.memory_space<vmem>>, vector<2x32x4096xf32>
    %c0_3 = arith.constant 0 : index
    %c0_4 = arith.constant 0 : index
    %4 = vector.load %arg8[%c0_3, %c0_4] : memref<2x32xf32, #tpu.memory_space<vmem>>, vector<2x32xf32>
    %cst = arith.constant dense<0.000000e+00> : vector<2x32xf32>
    %5 = vector.multi_reduction <add>, %3, %cst [2] : vector<2x32x4096xf32> to vector<2x32xf32>
    %6 = arith.addf %4, %5 : vector<2x32xf32>
    %c0_5 = arith.constant 0 : index
    %c0_6 = arith.constant 0 : index
    %7 = vector.load %arg8[%c0_5, %c0_6] : memref<2x32xf32, #tpu.memory_space<vmem>>, vector<2x32xf32>
    tpu.vector_store %arg8[%c0_5, %c0_6], %6 {strides = array<i32>} : memref<2x32xf32, #tpu.memory_space<vmem>>, vector<2x32xf32>,
    %c0_i32_7 = arith.constant 0 : i32
    %8 = arith.cmpi eq, %arg1, %c0_i32_7 : i32
    %9 = arith.extui %8 : i1 to i32
    %c0_i32_8 = arith.constant 0 : i32
    %10 = arith.cmpi ne, %9, %c0_i32_8 : i32
    scf.if %10 {
      %c0_9 = arith.constant 0 : index
      %c0_10 = arith.constant 0 : index
      %11 = vector.load %arg8[%c0_9, %c0_10] : memref<2x32xf32, #tpu.memory_space<vmem>>, vector<2x32xf32>
      %cst_11 = arith.constant 2.44140625E-4 : f32
      %12 = vector.broadcast %cst_11 : f32 to vector<2x32xf32>
      %13 = arith.mulf %11, %12 : vector<2x32xf32>
      %c0_12 = arith.constant 0 : index
      %c0_13 = arith.constant 0 : index
      %14 = vector.load %arg3[%c0_12, %c0_13] : memref<32x256xf32, #tpu.memory_space<vmem>>, vector<32x256xf32>
      %cst_14 = arith.constant dense<0.000000e+00> : vector<2x256xf32>
      %15 = tpu.matmul %13, %14, %cst_14 {dimension_numbers = #tpu.dot_dimension_numbers<[1], [0], [0], [1], [0, 0, 1, 1], [], []>} : vector<2x32xf32>, vector<32x256xf32>, vector<2x256xf32> -> vector<2x256xf32>
      %c0_15 = arith.constant 0 : index
      %c0_16 = arith.constant 0 : index
      %16 = vector.load %arg4[%c0_15, %c0_16] : memref<1x256xf32, #tpu.memory_space<vmem>>, vector<1x256xf32>
      %17 = vector.broadcast %16 : vector<1x256xf32> to vector<2x256xf32>
      %18 = arith.addf %15, %17 : vector<2x256xf32>
      %cst_17 = arith.constant 0.000000e+00 : f32
      %19 = vector.broadcast %cst_17 : f32 to vector<2x256xf32>
      %20 = arith.maximumf %18, %19 : vector<2x256xf32>
      %c0_18 = arith.constant 0 : index
      %c0_19 = arith.constant 0 : index
      %21 = vector.load %arg5[%c0_18, %c0_19] : memref<1x256xf32, #tpu.memory_space<vmem>>, vector<1x256xf32>
      %22 = vector.broadcast %21 : vector<1x256xf32> to vector<2x256xf32>
      %23 = arith.mulf %20, %22 : vector<2x256xf32>
      %cst_20 = arith.constant dense<0.000000e+00> : vector<2xf32>
      %24 = vector.multi_reduction <add>, %23, %cst_20 [1] : vector<2x256xf32> to vector<2xf32>
      %25 = vector.shape_cast %24 : vector<2xf32> to vector<2x1xf32>
      %c0_21 = arith.constant 0 : index
      %26 = memref.load %arg6[%c0_21] : memref<1xf32, #tpu.memory_space<smem>>
      %27 = vector.broadcast %26 : f32 to vector<2x1xf32>
      %28 = arith.addf %25, %27 : vector<2x1xf32>
      %29 = math.absf %28 : vector<2x1xf32>
      %c0_22 = arith.constant 0 : index
      %c0_23 = arith.constant 0 : index
      %30 = vector.load %arg7[%c0_22, %c0_23] : memref<2x1xf32, #tpu.memory_space<vmem>>, vector<2x1xf32>
      tpu.vector_store %arg7[%c0_22, %c0_23], %29 {strides = array<i32>} : memref<2x1xf32, #tpu.memory_space<vmem>>, vector<2x1xf32>,
    } else {
    }
    return
  }
  func.func @transform_0(%arg0: i32, %arg1: i32) -> (i32, i32, i32) {
    %c0_i32 = arith.constant 0 : i32
    %c0_i32_0 = arith.constant 0 : i32
    return %arg0, %c0_i32, %arg1 : i32, i32, i32
  }
  func.func @transform_1(%arg0: i32, %arg1: i32) -> (i32, i32) {
    %c0_i32 = arith.constant 0 : i32
    %c0_i32_0 = arith.constant 0 : i32
    %c0_i32_1 = arith.constant 0 : i32
    return %c0_i32, %c0_i32_0 : i32, i32
  }
  func.func @transform_2(%arg0: i32, %arg1: i32) -> (i32, i32) {
    %c0_i32 = arith.constant 0 : i32
    %c0_i32_0 = arith.constant 0 : i32
    %c0_i32_1 = arith.constant 0 : i32
    return %c0_i32, %c0_i32_0 : i32, i32
  }
  func.func @transform_3(%arg0: i32, %arg1: i32) -> (i32, i32) {
    %c0_i32 = arith.constant 0 : i32
    %c0_i32_0 = arith.constant 0 : i32
    %c0_i32_1 = arith.constant 0 : i32
    return %c0_i32, %c0_i32_0 : i32, i32
  }
  func.func @transform_4(%arg0: i32, %arg1: i32) -> i32 {
    %c0_i32 = arith.constant 0 : i32
    %c0_i32_0 = arith.constant 0 : i32
    return %c0_i32 : i32
  }
  func.func @transform_5(%arg0: i32, %arg1: i32) -> (i32, i32) {
    %c0_i32 = arith.constant 0 : i32
    %c0_i32_0 = arith.constant 0 : i32
    return %arg0, %c0_i32 : i32, i32
  }
}

</mosaic_0001>

<bundles_post_ra>
// kernel: tpu_custom_call.1
= control target key start
LH: loop header
LB: loop body
LE: loop exit
PB: predicated region body
PF: predicated region fallthrough
CT: control target
= control target key end

     0   :  { %11 = vsyncpa [#allocation5], 0  ;;  %s877_s0 = inlined_call_operand.hbm [shape: f32[2,32,4096], index: 0, kind: input, shape index: {}]   ;;  %s878_s1 = inlined_call_operand.hbm [shape: f32[32,256], index: 1, kind: input, shape index: {}]   ;;  %s879_s2 = inlined_call_operand.vmem [shape: f32[1,256], index: 2, kind: input, shape index: {}]   ;;  %s880_s3 = inlined_call_operand.vmem [shape: f32[1,256], index: 3, kind: input, shape index: {}]   ;;  %s881_s4 = inlined_call_operand.<no memory space> [shape: f32[1], index: 4, kind: input, shape index: {}]   ;;  %s882_s5 = inlined_call_operand.vmem [shape: f32[2,1], index: 5, kind: output, shape index: {}]  }
   0x1   :  { %12 = vsyncpa [#allocation7], 0  ;;  %s821_s18 = smov [#allocation4]  }
   0x2   :  { %s18_s19 = sshll.u32 %s821_s18, 4  ;;  %s19_s19 = int_to_ptr.vmem [resolvable:$true] %s18_s19 }
   0x3   :  { %s785_s20 = scalar_lea.vmem %s19_s19, 32768  ;;  %p790_p1 = scmp.lt.s32.totalorder %s19_s19, %s19_s19 }
   0x4   :  { %p786_p0 = scmp.ne.s32.totalorder %s19_s19, %s785_s20  ;;  %p791_p2 = scmp.lt.s32.totalorder %s785_s20, %s785_s20 }
   0x6   :  { %p792_p3 = por %p791_p2, %p790_p1 }
   0x8   :  { %p793_p4 = pnand %p792_p3, %p786_p0 }
   0xa   :  { %796 = shalt.err (!%p793_p4)
}
   0xb   :  { %s822_s21 = smov 4096   ;;  %s823_s22 = smov 256  }
   0xc   :  { %24 = dma.hbm_to_vmem [thread:$0]  %s877_s0, 32768, %s19_s19, [#allocation5], %s822_s21, %s822_s21, %s823_s22  }
   0xd   :  { %s824_s25 = smov [#allocation6]  }
   0xe   :  { %s30_s26 = sshll.u32 %s824_s25, 4  ;;  %s31_s26 = int_to_ptr.vmem [resolvable:$true] %s30_s26 }
   0xf   :  { %s805_s27 = scalar_lea.vmem %s31_s26, 1024  ;;  %p810_p6 = scmp.lt.s32.totalorder %s31_s26, %s31_s26 }
  0x10   :  { %p806_p5 = scmp.ne.s32.totalorder %s31_s26, %s805_s27  ;;  %p811_p7 = scmp.lt.s32.totalorder %s805_s27, %s805_s27 }
  0x12   :  { %p812_p8 = por %p811_p7, %p810_p6 }
  0x14   :  { %p813_p9 = pnand %p812_p8, %p806_p5 }
  0x16   :  { %816 = shalt.err (!%p813_p9)
}
  0x17   :  { %s825_s28 = smov 16  }
  0x18   :  { %36 = dma.hbm_to_vmem [thread:$0]  %s878_s1, 1024, %s31_s26, [#allocation7], %s823_s22, %s823_s22, %s825_s28  }
  0x19   :  { %817 = dma.done.wait [#allocation5], 32768  }
  0x1a   :  { %818 = vsyncadd [#allocation5], 4294934528 }
  0x1b   :  { %819 = dma.done.wait [#allocation7], 1024  }
  0x1c   :  { %820 = vsyncadd [#allocation7], 4294966272  ;;  %v183_v0 = vld [vmem:[#allocation4 + $0x400] sm:$0xff]  ;;  %v184_v1 = vld [vmem:[#allocation4 + $0x408] sm:$0xff]  ;;  %vm53_vm0 = vcmask 254976   ;;  %vm595_vm1 = vcmask 130112  }
  0x1d   :  { %v185_v2 = vld [vmem:[#allocation4 + $0x410] sm:$0xff]  ;;  %v444_v3 = vadd.f32 %v184_v1, %v183_v0  ;;  %v186_v4 = vld [vmem:[#allocation4 + $0x418] sm:$0xff]  ;;  %v187_v6 = vld [vmem:[#allocation4 + $0x420] sm:$0xff]  ;;  %vm602_vm2 = vcmask 195712   ;;  %vm609_vm3 = vcmask 261312   ;;  %vm630_vm4 = vcmask 1041409  }
  0x1e   :  { %v188_v8 = vld [vmem:[#allocation4 + $0x428] sm:$0xff]  ;;  %v189_v10 = vld [vmem:[#allocation4 + $0x430] sm:$0xff]  ;;  %v190_v12 = vld [vmem:[#allocation4 + $0x438] sm:$0xff]  ;;  %vm661_vm5 = vcmask 261120   ;;  %vm752_vm6 = vcmask 1041408   ;;  %vm762_vm7 = vcmask 1024  }
  0x1f   :  { %v445_v5 = vadd.f32 %v444_v3, %v185_v2  ;;  %v55_v13 = vld [vmem:[#allocation4] sm:$0xff]  ;;  %v56_v15 = vld [vmem:[#allocation4 + $0x8] sm:$0xff]  ;;  %v57_v16 = vld [vmem:[#allocation4 + $0x10] sm:$0xff] }
  0x20   :  { %v191_v17 = vld [vmem:[#allocation4 + $0x440] sm:$0xff]  ;;  %v312_v18 = vadd.f32 %v56_v15, %v55_v13  ;;  %v58_v20 = vld [vmem:[#allocation4 + $0x18] sm:$0xff]  ;;  %v192_v21 = vld [vmem:[#allocation4 + $0x448] sm:$0xff] }
  0x21   :  { %v446_v7 = vadd.f32 %v445_v5, %v186_v4  ;;  %v59_v24 = vld [vmem:[#allocation4 + $0x20] sm:$0xff]  ;;  %v193_v25 = vld [vmem:[#allocation4 + $0x450] sm:$0xff]  ;;  %v60_v28 = vld [vmem:[#allocation4 + $0x28] sm:$0xff] }
  0x22   :  { %v313_v22 = vadd.f32 %v312_v18, %v57_v16  ;;  %v194_v29 = vld [vmem:[#allocation4 + $0x458] sm:$0xff]  ;;  %v61_v32 = vld [vmem:[#allocation4 + $0x30] sm:$0xff]  ;;  %v195_v33 = vld [vmem:[#allocation4 + $0x460] sm:$0xff] }
  0x23   :  { %v447_v9 = vadd.f32 %v446_v7, %v187_v6  ;;  %v62_v36 = vld [vmem:[#allocation4 + $0x38] sm:$0xff]  ;;  %v215_v37 = vld [vmem:[#allocation4 + $0x500] sm:$0xff]  ;;  %v216_v38 = vld [vmem:[#allocation4 + $0x508] sm:$0xff] }
  0x24   :  { %v314_v26 = vadd.f32 %v313_v22, %v58_v20  ;;  %v196_v39 = vld [vmem:[#allocation4 + $0x468] sm:$0xff]  ;;  %v217_v41 = vld [vmem:[#allocation4 + $0x510] sm:$0xff]  ;;  %v477_v42 = vadd.f32 %v216_v38, %v215_v37  ;;  %v63_v44 = vld [vmem:[#allocation4 + $0x40] sm:$0xff] }
  0x25   :  { %v448_v11 = vadd.f32 %v447_v9, %v188_v8  ;;  %v218_v45 = vld [vmem:[#allocation4 + $0x518] sm:$0xff]  ;;  %v197_v46 = vld [vmem:[#allocation4 + $0x470] sm:$0xff]  ;;  %v64_v50 = vld [vmem:[#allocation4 + $0x48] sm:$0xff] }
  0x26   :  { %v315_v30 = vadd.f32 %v314_v26, %v59_v24  ;;  %v478_v48 = vadd.f32 %v477_v42, %v217_v41  ;;  %v219_v51 = vld [vmem:[#allocation4 + $0x520] sm:$0xff]  ;;  %v198_v52 = vld [vmem:[#allocation4 + $0x478] sm:$0xff]  ;;  %v65_v56 = vld [vmem:[#allocation4 + $0x50] sm:$0xff] }
  0x27   :  { %v449_v14 = vadd.f32 %v448_v11, %v189_v10  ;;  %v220_v57 = vld [vmem:[#allocation4 + $0x528] sm:$0xff]  ;;  %v199_v58 = vld [vmem:[#allocation4 + $0x480] sm:$0xff]  ;;  %v66_v62 = vld [vmem:[#allocation4 + $0x58] sm:$0xff] }
  0x28   :  { %v316_v34 = vadd.f32 %v315_v30, %v60_v28  ;;  %v479_v54 = vadd.f32 %v478_v48, %v218_v45  ;;  %v221_v63 = vld [vmem:[#allocation4 + $0x530] sm:$0xff]  ;;  %v200_v0 = vld [vmem:[#allocation4 + $0x488] sm:$0xff]  ;;  %v67_v5 = vld [vmem:[#allocation4 + $0x60] sm:$0xff] }
  0x29   :  { %v450_v19 = vadd.f32 %v449_v14, %v190_v12  ;;  %v201_v3 = vld [vmem:[#allocation4 + $0x490] sm:$0xff]  ;;  %v222_v6 = vld [vmem:[#allocation4 + $0x538] sm:$0xff]  ;;  %v87_v9 = vld [vmem:[#allocation4 + $0x100] sm:$0xff] }
  0x2a   :  { %v317_v40 = vadd.f32 %v316_v34, %v61_v32  ;;  %v480_v60 = vadd.f32 %v479_v54, %v219_v51  ;;  %v88_v10 = vld [vmem:[#allocation4 + $0x108] sm:$0xff]  ;;  %v89_v11 = vld [vmem:[#allocation4 + $0x110] sm:$0xff]  ;;  %v223_v14 = vld [vmem:[#allocation4 + $0x540] sm:$0xff] }
  0x2b   :  { %v451_v23 = vadd.f32 %v450_v19, %v191_v17  ;;  %v68_v13 = vld [vmem:[#allocation4 + $0x68] sm:$0xff]  ;;  %v345_v15 = vadd.f32 %v88_v10, %v87_v9  ;;  %v202_v16 = vld [vmem:[#allocation4 + $0x498] sm:$0xff]  ;;  %v203_v24 = vld [vmem:[#allocation4 + $0x4a0] sm:$0xff] }
  0x2c   :  { %v318_v47 = vadd.f32 %v317_v40, %v62_v36  ;;  %v481_v2 = vadd.f32 %v480_v60, %v220_v57  ;;  %v90_v19 = vld [vmem:[#allocation4 + $0x118] sm:$0xff]  ;;  %v224_v22 = vld [vmem:[#allocation4 + $0x548] sm:$0xff]  ;;  %v225_v30 = vld [vmem:[#allocation4 + $0x550] sm:$0xff] }
  0x2d   :  { %v452_v27 = vadd.f32 %v451_v23, %v192_v21  ;;  %v69_v21 = vld [vmem:[#allocation4 + $0x70] sm:$0xff]  ;;  %v346_v23 = vadd.f32 %v345_v15, %v89_v11  ;;  %v204_v32 = vld [vmem:[#allocation4 + $0x4a8] sm:$0xff]  ;;  %v71_v37 = vld [vmem:[#allocation4 + $0x80] sm:$0xff] }
  0x2e   :  { %v319_v53 = vadd.f32 %v318_v47, %v63_v44  ;;  %v482_v8 = vadd.f32 %v481_v2, %v221_v63  ;;  %v226_v38 = vld [vmem:[#allocation4 + $0x558] sm:$0xff]  ;;  %v205_v40 = vld [vmem:[#allocation4 + $0x4b0] sm:$0xff]  ;;  %v227_v47 = vld [vmem:[#allocation4 + $0x560] sm:$0xff] }
  0x2f   :  { %v453_v31 = vadd.f32 %v452_v27, %v193_v25  ;;  %v91_v27 = vld [vmem:[#allocation4 + $0x120] sm:$0xff]  ;;  %v206_v44 = vld [vmem:[#allocation4 + $0x4b8] sm:$0xff]  ;;  %v248_v57 = vld [vmem:[#allocation4 + $0x608] sm:$0xff] }
  0x30   :  { %v320_v59 = vadd.f32 %v319_v53, %v64_v50  ;;  %v483_v18 = vadd.f32 %v482_v8, %v222_v6  ;;  %v247_v53 = vld [vmem:[#allocation4 + $0x600] sm:$0xff]  ;;  %v229_v2 = vld [vmem:[#allocation4 + $0x570] sm:$0xff]  ;;  %v96_v8 = vld [vmem:[#allocation4 + $0x148] sm:$0xff] }
  0x31   :  { %v454_v35 = vadd.f32 %v453_v31, %v194_v29  ;;  %v70_v29 = vld [vmem:[#allocation4 + $0x78] sm:$0xff]  ;;  %v347_v31 = vadd.f32 %v346_v23, %v90_v19  ;;  %v510_v63 = vadd.f32 %v248_v57, %v247_v53  ;;  %v75_v11 = vld [vmem:[#allocation4 + $0xa0] sm:$0xff]  ;;  %v209_v15 = vld [vmem:[#allocation4 + $0x4d0] sm:$0xff] }
  0x32   :  { %v321_v1 = vadd.f32 %v320_v59, %v65_v56  ;;  %v484_v26 = vadd.f32 %v483_v18, %v223_v14  ;;  %v207_v59 = vld [vmem:[#allocation4 + $0x4c0] sm:$0xff]  ;;  %v97_v18 = vld [vmem:[#allocation4 + $0x150] sm:$0xff] }
  0x33   :  { %v455_v43 = vadd.f32 %v454_v35, %v195_v33  ;;  %v92_v35 = vld [vmem:[#allocation4 + $0x128] sm:$0xff]  ;;  %v251_v14 = vld [vmem:[#allocation4 + $0x620] sm:$0xff]  ;;  %v121_v53 = vld [vmem:[#allocation4 + $0x210] sm:$0xff] }
  0x34   :  { %v322_v7 = vadd.f32 %v321_v1, %v66_v62  ;;  %v485_v34 = vadd.f32 %v484_v26, %v224_v22  ;;  %v95_v62 = vld [vmem:[#allocation4 + $0x140] sm:$0xff]  ;;  %v74_v1 = vld [vmem:[#allocation4 + $0x98] sm:$0xff] }
  0x35   :  { %v456_v49 = vadd.f32 %v455_v43, %v196_v39  ;;  %v348_v39 = vadd.f32 %v347_v31, %v91_v27  ;;  %v93_v43 = vld [vmem:[#allocation4 + $0x130] sm:$0xff]  ;;  %v231_v22 = vld [vmem:[#allocation4 + $0x580] sm:$0xff] }
  0x36   :  { %v323_v17 = vadd.f32 %v322_v7, %v67_v5  ;;  %v486_v42 = vadd.f32 %v485_v34, %v225_v30  ;;  %v208_v5 = vld [vmem:[#allocation4 + $0x4c8] sm:$0xff]  ;;  %v211_v26 = vld [vmem:[#allocation4 + $0x4e0] sm:$0xff] }
  0x37   :  { %v457_v55 = vadd.f32 %v456_v49, %v197_v46  ;;  %v72_v46 = vld [vmem:[#allocation4 + $0x88] sm:$0xff]  ;;  %v349_v48 = vadd.f32 %v348_v39, %v92_v35  ;;  %v73_v49 = vld [vmem:[#allocation4 + $0x90] sm:$0xff] }
  0x38   :  { %v324_v25 = vadd.f32 %v323_v17, %v68_v13  ;;  %v487_v51 = vadd.f32 %v486_v42, %v226_v38  ;;  %v253_v35 = vld [vmem:[#allocation4 + $0x630] sm:$0xff] }
  0x39   :  { %v458_v61 = vadd.f32 %v457_v55, %v198_v52  ;;  %v94_v52 = vld [vmem:[#allocation4 + $0x138] sm:$0xff]  ;;  %v228_v55 = vld [vmem:[#allocation4 + $0x568] sm:$0xff]  ;;  %v350_v56 = vadd.f32 %v349_v48, %v93_v43  ;;  %v233_v39 = vld [vmem:[#allocation4 + $0x590] sm:$0xff] }
  0x3a   :  { %v325_v33 = vadd.f32 %v324_v25, %v69_v21  ;;  %v76_v21 = vld [vmem:[#allocation4 + $0xa8] sm:$0xff]  ;;  %v210_v25 = vld [vmem:[#allocation4 + $0x4d8] sm:$0xff]  ;;  %v79_v48 = vld [vmem:[#allocation4 + $0xc0] sm:$0xff] }
  0x3b   :  { %v459_v4 = vadd.f32 %v458_v61, %v199_v58  ;;  %v249_v58 = vld [vmem:[#allocation4 + $0x610] sm:$0xff]  ;;  %v488_v61 = vadd.f32 %v487_v51, %v227_v47  ;;  %v120_v47 = vld [vmem:[#allocation4 + $0x208] sm:$0xff] }
  0x3c   :  { %v326_v41 = vadd.f32 %v325_v33, %v70_v29  ;;  %v511_v9 = vadd.f32 %v510_v63, %v249_v58  ;;  %v98_v29 = vld [vmem:[#allocation4 + $0x158] sm:$0xff]  ;;  %v232_v33 = vld [vmem:[#allocation4 + $0x588] sm:$0xff]  ;;  %v255_v58 = vld [vmem:[#allocation4 + $0x640] sm:$0xff] }
  0x3d   :  { %v460_v12 = vadd.f32 %v459_v4, %v200_v0  ;;  %v250_v4 = vld [vmem:[#allocation4 + $0x618] sm:$0xff]  ;;  %v489_v7 = vadd.f32 %v488_v61, %v228_v55  ;;  %v100_v51 = vld [vmem:[#allocation4 + $0x168] sm:$0xff] }
  0x3e   :  { %v327_v50 = vadd.f32 %v326_v41, %v71_v37  ;;  %v512_v19 = vadd.f32 %v511_v9, %v250_v4  ;;  %v78_v37 = vld [vmem:[#allocation4 + $0xb8] sm:$0xff]  ;;  %v99_v41 = vld [vmem:[#allocation4 + $0x160] sm:$0xff]  ;;  %v80_v61 = vld [vmem:[#allocation4 + $0xc8] sm:$0xff] }
  0x3f   :  { %v461_v20 = vadd.f32 %v460_v12, %v201_v3  ;;  %v351_v3 = vadd.f32 %v350_v56, %v94_v52  ;;  %v230_v12 = vld [vmem:[#allocation4 + $0x578] sm:$0xff]  ;;  %v490_v17 = vadd.f32 %v489_v7, %v229_v2  ;;  %v235_v4 = vld [vmem:[#allocation4 + $0x5a0] sm:$0xff]  ;;  %v81_v9 = vld [vmem:[#allocation4 + $0xd0] sm:$0xff] }
  0x40   :  { %v328_v60 = vadd.f32 %v327_v50, %v72_v46  ;;  %v513_v30 = vadd.f32 %v512_v19, %v251_v14  ;;  %v119_v46 = vld [vmem:[#allocation4 + $0x200] sm:$0xff]  ;;  %v234_v56 = vld [vmem:[#allocation4 + $0x598] sm:$0xff]  ;;  %v124_v19 = vld [vmem:[#allocation4 + $0x228] sm:$0xff] }
  0x41   :  { %v462_v28 = vadd.f32 %v461_v20, %v202_v16  ;;  %v352_v13 = vadd.f32 %v351_v3, %v95_v62  ;;  %v123_v7 = vld [vmem:[#allocation4 + $0x220] sm:$0xff] }
  0x42   :  { %v329_v6 = vadd.f32 %v328_v60, %v73_v49  ;;  %v213_v60 = vld [vmem:[#allocation4 + $0x4f0] sm:$0xff] }
  0x43   :  { %v463_v36 = vadd.f32 %v462_v28, %v203_v24  ;;  %v353_v23 = vadd.f32 %v352_v13, %v96_v8  ;;  %v252_v24 = vld [vmem:[#allocation4 + $0x628] sm:$0xff]  ;;  %v491_v28 = vadd.f32 %v490_v17, %v230_v12  ;;  %v214_v8 = vld [vmem:[#allocation4 + $0x4f8] sm:$0xff] }
  0x44   :  { %v330_v16 = vadd.f32 %v329_v6, %v74_v1  ;;  %v514_v42 = vadd.f32 %v513_v30, %v252_v24  ;;  %v256_v6 = vld [vmem:[#allocation4 + $0x648] sm:$0xff]  ;;  %v102_v12 = vld [vmem:[#allocation4 + $0x178] sm:$0xff]  ;;  %v125_v30 = vld [vmem:[#allocation4 + $0x230] sm:$0xff] }
  0x45   :  { %v464_v45 = vadd.f32 %v463_v36, %v204_v32  ;;  %v77_v32 = vld [vmem:[#allocation4 + $0xb0] sm:$0xff]  ;;  %v354_v34 = vadd.f32 %v353_v23, %v97_v18  ;;  %v212_v36 = vld [vmem:[#allocation4 + $0x4e8] sm:$0xff]  ;;  %v103_v23 = vld [vmem:[#allocation4 + $0x180] sm:$0xff] }
  0x46   :  { %v331_v27 = vadd.f32 %v330_v16, %v75_v11  ;;  %v515_v52 = vadd.f32 %v514_v42, %v253_v35  ;;  %v236_v16 = vld [vmem:[#allocation4 + $0x5a8] sm:$0xff]  ;;  %v257_v18 = vld [vmem:[#allocation4 + $0x650] sm:$0xff]  ;;  %v126_v42 = vld [vmem:[#allocation4 + $0x238] sm:$0xff] }
  0x47   :  { %v465_v54 = vadd.f32 %v464_v45, %v205_v40  ;;  %v492_v40 = vadd.f32 %v491_v28, %v231_v22  ;;  %v254_v45 = vld [vmem:[#allocation4 + $0x638] sm:$0xff]  ;;  %v104_v35 = vld [vmem:[#allocation4 + $0x188] sm:$0xff] }
  0x48   :  { %v332_v38 = vadd.f32 %v331_v27, %v76_v21  ;;  %v516_v1 = vadd.f32 %v515_v52, %v254_v45  ;;  %v237_v27 = vld [vmem:[#allocation4 + $0x5b0] sm:$0xff]  ;;  %v260_v52 = vld [vmem:[#allocation4 + $0x668] sm:$0xff] }
  0x49   :  { %v466_v0 = vadd.f32 %v465_v54, %v206_v44  ;;  %v355_v44 = vadd.f32 %v354_v34, %v98_v29  ;;  %v493_v50 = vadd.f32 %v492_v40, %v232_v33  ;;  %v378_v54 = vadd.f32 %v120_v47, %v119_v46  ;;  %v258_v29 = vld [vmem:[#allocation4 + $0x658] sm:$0xff]  ;;  %v279_v47 = vld [vmem:[#allocation4 + $0x700] sm:$0xff] }
  0x4a   :  { %v333_v49 = vadd.f32 %v332_v38, %v77_v32  ;;  %v517_v13 = vadd.f32 %v516_v1, %v255_v58  ;;  %v238_v33 = vld [vmem:[#allocation4 + $0x5b8] sm:$0xff]  ;;  %v84_v38 = vld [vmem:[#allocation4 + $0xe8] sm:$0xff] }
  0x4b   :  { %v467_v10 = vadd.f32 %v466_v0, %v207_v59  ;;  %v356_v57 = vadd.f32 %v355_v44, %v99_v41  ;;  %v122_v59 = vld [vmem:[#allocation4 + $0x218] sm:$0xff]  ;;  %v494_v63 = vadd.f32 %v493_v50, %v233_v39  ;;  %v101_v0 = vld [vmem:[#allocation4 + $0x170] sm:$0xff]  ;;  %v379_v2 = vadd.f32 %v378_v54, %v121_v53  ;;  %v259_v41 = vld [vmem:[#allocation4 + $0x660] sm:$0xff] }
  0x4c   :  { %v334_v62 = vadd.f32 %v333_v49, %v78_v37  ;;  %v518_v24 = vadd.f32 %v517_v13, %v256_v6  ;;  %v105_v39 = vld [vmem:[#allocation4 + $0x190] sm:$0xff]  ;;  %v239_v50 = vld [vmem:[#allocation4 + $0x5c0] sm:$0xff]  ;;  %v106_v58 = vld [vmem:[#allocation4 + $0x198] sm:$0xff] }
  0x4d   :  { %v468_v20 = vadd.f32 %v467_v10, %v208_v5  ;;  %v357_v5 = vadd.f32 %v356_v57, %v100_v51  ;;  %v495_v11 = vadd.f32 %v494_v63, %v234_v56  ;;  %v380_v14 = vadd.f32 %v379_v2, %v122_v59  ;;  %v281_v49 = vld [vmem:[#allocation4 + $0x710] sm:$0xff]  ;;  %v127_v53 = vld [vmem:[#allocation4 + $0x240] sm:$0xff]  ;;  %v128_v1 = vld [vmem:[#allocation4 + $0x248] sm:$0xff] }
  0x4e   :  { %v335_v10 = vadd.f32 %v334_v62, %v79_v48  ;;  %v280_v48 = vld [vmem:[#allocation4 + $0x708] sm:$0xff]  ;;  %v107_v6 = vld [vmem:[#allocation4 + $0x1a0] sm:$0xff]  ;;  %v129_v13 = vld [vmem:[#allocation4 + $0x250] sm:$0xff] }
  0x4f   :  { %v469_v31 = vadd.f32 %v468_v20, %v209_v15  ;;  %v358_v17 = vadd.f32 %v357_v5, %v101_v0  ;;  %v82_v20 = vld [vmem:[#allocation4 + $0xd8] sm:$0xff]  ;;  %v496_v22 = vadd.f32 %v495_v11, %v235_v4  ;;  %v543_v54 = vadd.f32 %v280_v48, %v279_v47  ;;  %v240_v62 = vld [vmem:[#allocation4 + $0x5c8] sm:$0xff]  ;;  %v261_v0 = vld [vmem:[#allocation4 + $0x670] sm:$0xff] }
  0x50   :  { %v336_v21 = vadd.f32 %v335_v10, %v80_v61  ;;  %v282_v61 = vld [vmem:[#allocation4 + $0x718] sm:$0xff]  ;;  %v241_v10 = vld [vmem:[#allocation4 + $0x5d0] sm:$0xff]  ;;  %v152_v48 = vld [vmem:[#allocation4 + $0x308] sm:$0xff] }
  0x51   :  { %v470_v43 = vadd.f32 %v469_v31, %v210_v25  ;;  %v381_v25 = vadd.f32 %v380_v14, %v123_v7  ;;  %v359_v28 = vadd.f32 %v358_v17, %v102_v12  ;;  %v83_v31 = vld [vmem:[#allocation4 + $0xe0] sm:$0xff]  ;;  %v497_v34 = vadd.f32 %v496_v22, %v236_v16  ;;  %v262_v12 = vld [vmem:[#allocation4 + $0x678] sm:$0xff]  ;;  %v108_v17 = vld [vmem:[#allocation4 + $0x1a8] sm:$0xff] }
  0x52   :  { %v337_v32 = vadd.f32 %v336_v21, %v81_v9  ;;  %v544_v2 = vadd.f32 %v543_v54, %v281_v49  ;;  %v283_v9 = vld [vmem:[#allocation4 + $0x720] sm:$0xff]  ;;  %v242_v21 = vld [vmem:[#allocation4 + $0x5d8] sm:$0xff]  ;;  %v153_v49 = vld [vmem:[#allocation4 + $0x310] sm:$0xff] }
  0x53   :  { %v471_v55 = vadd.f32 %v470_v43, %v211_v26  ;;  %v382_v37 = vadd.f32 %v381_v25, %v124_v19  ;;  %v360_v40 = vadd.f32 %v359_v28, %v103_v23  ;;  %v498_v44 = vadd.f32 %v497_v34, %v237_v27  ;;  %v263_v23 = vld [vmem:[#allocation4 + $0x680] sm:$0xff]  ;;  %v110_v34 = vld [vmem:[#allocation4 + $0x1b8] sm:$0xff] }
  0x54   :  { %v338_v43 = vadd.f32 %v337_v32, %v82_v20  ;;  %v545_v14 = vadd.f32 %v544_v2, %v282_v61  ;;  %v284_v20 = vld [vmem:[#allocation4 + $0x728] sm:$0xff]  ;;  %v243_v27 = vld [vmem:[#allocation4 + $0x5e0] sm:$0xff]  ;;  %v285_v32 = vld [vmem:[#allocation4 + $0x730] sm:$0xff] }
  0x55   :  { %v472_v3 = vadd.f32 %v471_v55, %v212_v36  ;;  %v519_v36 = vadd.f32 %v518_v24, %v257_v18  ;;  %v383_v46 = vadd.f32 %v382_v37, %v125_v30  ;;  %v361_v51 = vadd.f32 %v360_v40, %v104_v35  ;;  %v85_v55 = vld [vmem:[#allocation4 + $0xf0] sm:$0xff]  ;;  %v130_v24 = vld [vmem:[#allocation4 + $0x258] sm:$0xff]  ;;  %v131_v37 = vld [vmem:[#allocation4 + $0x260] sm:$0xff] }
  0x56   :  { %v339_v56 = vadd.f32 %v338_v43, %v83_v31  ;;  %v499_v57 = vadd.f32 %v498_v44, %v238_v33  ;;  %v546_v25 = vadd.f32 %v545_v14, %v283_v9  ;;  %v244_v33 = vld [vmem:[#allocation4 + $0x5e8] sm:$0xff]  ;;  %v265_v40 = vld [vmem:[#allocation4 + $0x690] sm:$0xff]  ;;  %v286_v43 = vld [vmem:[#allocation4 + $0x738] sm:$0xff] }
  0x57   :  { %v473_v15 = vadd.f32 %v472_v3, %v213_v60  ;;  %v520_v45 = vadd.f32 %v519_v36, %v258_v29  ;;  %v384_v60 = vadd.f32 %v383_v46, %v126_v42  ;;  %v362_v63 = vadd.f32 %v361_v51, %v105_v39  ;;  %v86_v3 = vld [vmem:[#allocation4 + $0xf8] sm:$0xff]  ;;  %v109_v29 = vld [vmem:[#allocation4 + $0x1b0] sm:$0xff]  ;;  %v264_v36 = vld [vmem:[#allocation4 + $0x688] sm:$0xff] }
  0x58   :  { %v340_v4 = vadd.f32 %v339_v56, %v84_v38  ;;  %v500_v5 = vadd.f32 %v499_v57, %v239_v50  ;;  %v547_v38 = vadd.f32 %v546_v25, %v284_v20  ;;  %v151_v44 = vld [vmem:[#allocation4 + $0x300] sm:$0xff]  ;;  %v132_v46 = vld [vmem:[#allocation4 + $0x268] sm:$0xff]  ;;  %v245_v50 = vld [vmem:[#allocation4 + $0x5f0] sm:$0xff] }
  0x59   :  { %v474_v26 = vadd.f32 %v473_v15, %v214_v8  ;;  %v521_v59 = vadd.f32 %v520_v45, %v259_v41  ;;  %v385_v8 = vadd.f32 %v384_v60, %v127_v53  ;;  %v363_v11 = vadd.f32 %v362_v63, %v106_v58  ;;  %v266_v58 = vld [vmem:[#allocation4 + $0x698] sm:$0xff]  ;;  %v155_v9 = vld [vmem:[#allocation4 + $0x320] sm:$0xff]  ;;  %v289_v14 = vld [vmem:[#allocation4 + $0x750] sm:$0xff] }
  0x5a   :  { %v341_v15 = vadd.f32 %v340_v4, %v85_v55  ;;  %v501_v16 = vadd.f32 %v500_v5, %v240_v62  ;;  %v548_v47 = vadd.f32 %v547_v38, %v285_v32  ;;  %v287_v55 = vld [vmem:[#allocation4 + $0x740] sm:$0xff]  ;;  %v411_v56 = vadd.f32 %v152_v48, %v151_v44  ;;  %v154_v61 = vld [vmem:[#allocation4 + $0x318] sm:$0xff]  ;;  %v156_v20 = vld [vmem:[#allocation4 + $0x328] sm:$0xff] }
  0x5b   :  { %475 = vadd.xlane.f32.xlu1 %v474_v26  ;;  %v522_v7 = vadd.f32 %v521_v59, %v260_v52  ;;  %v386_v19 = vadd.f32 %v385_v8, %v128_v1  ;;  %v364_v22 = vadd.f32 %v363_v11, %v107_v6  ;;  %v111_v52 = vld [vmem:[#allocation4 + $0x1c0] sm:$0xff]  ;;  %v133_v59 = vld [vmem:[#allocation4 + $0x270] sm:$0xff]  ;;  %v246_v62 = vld [vmem:[#allocation4 + $0x5f8] sm:$0xff] }
  0x5c   :  { %v342_v26 = vadd.f32 %v341_v15, %v86_v3  ;;  %v502_v28 = vadd.f32 %v501_v16, %v241_v10  ;;  %v549_v60 = vadd.f32 %v548_v47, %v286_v43  ;;  %v288_v3 = vld [vmem:[#allocation4 + $0x748] sm:$0xff]  ;;  %v412_v4 = vadd.f32 %v411_v56, %v153_v49  ;;  %v267_v6 = vld [vmem:[#allocation4 + $0x6a0] sm:$0xff]  ;;  %v113_v11 = vld [vmem:[#allocation4 + $0x1d0] sm:$0xff] }
  0x5d   :  { %v523_v18 = vadd.f32 %v522_v7, %v261_v0  ;;  %v387_v31 = vadd.f32 %v386_v19, %v129_v13  ;;  %v365_v35 = vadd.f32 %v364_v22, %v108_v17  ;;  %v112_v0 = vld [vmem:[#allocation4 + $0x1c8] sm:$0xff]  ;;  %v134_v7 = vld [vmem:[#allocation4 + $0x278] sm:$0xff]  ;;  %v115_v32 = vld [vmem:[#allocation4 + $0x1e0] sm:$0xff] }
  0x5e   :  { %343 = vadd.xlane.f32.xlu0 %v342_v26  ;;  %v503_v39 = vadd.f32 %v502_v28, %v242_v21  ;;  %v550_v8 = vadd.f32 %v549_v60, %v287_v55  ;;  %v413_v15 = vadd.f32 %v412_v4, %v154_v61  ;;  %v268_v17 = vld [vmem:[#allocation4 + $0x6a8] sm:$0xff]  ;;  %v114_v22 = vld [vmem:[#allocation4 + $0x1d8] sm:$0xff]  ;;  %v269_v28 = vld [vmem:[#allocation4 + $0x6b0] sm:$0xff] }
  0x5f   :  { %v524_v30 = vadd.f32 %v523_v18, %v262_v12  ;;  %v388_v42 = vadd.f32 %v387_v31, %v130_v24  ;;  %v366_v45 = vadd.f32 %v365_v35, %v109_v29  ;;  %v135_v18 = vld [vmem:[#allocation4 + $0x280] sm:$0xff]  ;;  %v290_v25 = vld [vmem:[#allocation4 + $0x758] sm:$0xff]  ;;  %v136_v29 = vld [vmem:[#allocation4 + $0x288] sm:$0xff] }
  0x60   :  { %v504_v51 = vadd.f32 %v503_v39, %v243_v27  ;;  %v551_v19 = vadd.f32 %v550_v8, %v288_v3  ;;  %v414_v26 = vadd.f32 %v413_v15, %v155_v9  ;;  %v157_v31 = vld [vmem:[#allocation4 + $0x330] sm:$0xff]  ;;  %v291_v35 = vld [vmem:[#allocation4 + $0x760] sm:$0xff]  ;;  %v270_v38 = vld [vmem:[#allocation4 + $0x6b8] sm:$0xff] }
  0x61   :  { %v525_v41 = vadd.f32 %v524_v30, %v263_v23  ;;  %v389_v54 = vadd.f32 %v388_v42, %v131_v37  ;;  %v367_v57 = vadd.f32 %v366_v45, %v110_v34  ;;  %v137_v39 = vld [vmem:[#allocation4 + $0x290] sm:$0xff]  ;;  %v116_v42 = vld [vmem:[#allocation4 + $0x1e8] sm:$0xff]  ;;  %v271_v48 = vld [vmem:[#allocation4 + $0x6c0] sm:$0xff] }
  0x62   :  { %v505_v63 = vadd.f32 %v504_v51, %v244_v33  ;;  %v552_v30 = vadd.f32 %v551_v19, %v289_v14  ;;  %v292_v45 = vld [vmem:[#allocation4 + $0x768] sm:$0xff]  ;;  %v138_v49 = vld [vmem:[#allocation4 + $0x298] sm:$0xff]  ;;  %v159_v51 = vld [vmem:[#allocation4 + $0x340] sm:$0xff] }
  0x63   :  { %v526_v53 = vadd.f32 %v525_v41, %v264_v36  ;;  %v390_v2 = vadd.f32 %v389_v54, %v132_v46  ;;  %v368_v5 = vadd.f32 %v367_v57, %v111_v52  ;;  %v415_v36 = vadd.f32 %v414_v26, %v156_v20  ;;  %v158_v41 = vld [vmem:[#allocation4 + $0x338] sm:$0xff]  ;;  %v117_v52 = vld [vmem:[#allocation4 + $0x1f0] sm:$0xff]  ;;  %v160_v61 = vld [vmem:[#allocation4 + $0x348] sm:$0xff] }
  0x64   :  { %v506_v10 = vadd.f32 %v505_v63, %v245_v50  ;;  %v293_v55 = vld [vmem:[#allocation4 + $0x770] sm:$0xff]  ;;  %v296_v19 = vld [vmem:[#allocation4 + $0x788] sm:$0xff] }
  0x65   :  { %v527_v1 = vadd.f32 %v526_v53, %v265_v40  ;;  %v391_v13 = vadd.f32 %v390_v2, %v133_v59  ;;  %v369_v16 = vadd.f32 %v368_v5, %v112_v0  ;;  %v553_v40 = vadd.f32 %v552_v30, %v290_v25  ;;  %v139_v59 = vld [vmem:[#allocation4 + $0x2a0] sm:$0xff]  ;;  %v273_v4 = vld [vmem:[#allocation4 + $0x6d0] sm:$0xff]  ;;  %v140_v5 = vld [vmem:[#allocation4 + $0x2a8] sm:$0xff] }
  0x66   :  { %v507_v21 = vadd.f32 %v506_v10, %v246_v62  ;;  %v416_v46 = vadd.f32 %v415_v36, %v157_v31  ;;  %v118_v62 = vld [vmem:[#allocation4 + $0x1f8] sm:$0xff]  ;;  %v295_v10 = vld [vmem:[#allocation4 + $0x780] sm:$0xff]  ;;  %v141_v14 = vld [vmem:[#allocation4 + $0x2b0] sm:$0xff] }
  0x67   :  { %v528_v12 = vadd.f32 %v527_v1, %v266_v58  ;;  %v392_v24 = vadd.f32 %v391_v13, %v134_v7  ;;  %v370_v27 = vadd.f32 %v369_v16, %v113_v11  ;;  %v554_v50 = vadd.f32 %v553_v40, %v291_v35  ;;  %v272_v58 = vld [vmem:[#allocation4 + $0x6c8] sm:$0xff]  ;;  %v294_v1 = vld [vmem:[#allocation4 + $0x778] sm:$0xff]  ;;  %v161_v7 = vld [vmem:[#allocation4 + $0x350] sm:$0xff] }
  0x68   :  { %508 = vadd.xlane.f32.xlu1 %v507_v21  ;;  %v417_v56 = vadd.f32 %v416_v46, %v158_v41  ;;  %v274_v13 = vld [vmem:[#allocation4 + $0x6d8] sm:$0xff]  ;;  %v275_v21 = vld [vmem:[#allocation4 + $0x6e0] sm:$0xff]  ;;  %v165_v40 = vld [vmem:[#allocation4 + $0x370] sm:$0xff] }
  0x69   :  { %v529_v23 = vadd.f32 %v528_v12, %v267_v6  ;;  %v393_v34 = vadd.f32 %v392_v24, %v135_v18  ;;  %v371_v37 = vadd.f32 %v370_v27, %v114_v22  ;;  %v555_v60 = vadd.f32 %v554_v50, %v292_v45  ;;  %v162_v16 = vld [vmem:[#allocation4 + $0x358] sm:$0xff]  ;;  %v163_v24 = vld [vmem:[#allocation4 + $0x360] sm:$0xff]  ;;  %v297_v27 = vld [vmem:[#allocation4 + $0x790] sm:$0xff] }
  0x6a   :  { %v418_v2 = vadd.f32 %v417_v56, %v159_v51  ;;  %v142_v22 = vld [vmem:[#allocation4 + $0x2b8] sm:$0xff]  ;;  %v143_v30 = vld [vmem:[#allocation4 + $0x2c0] sm:$0xff]  ;;  %v145_v46 = vld [vmem:[#allocation4 + $0x2d0] sm:$0xff] }
  0x6b   :  { %v530_v33 = vadd.f32 %v529_v23, %v268_v17  ;;  %v394_v44 = vadd.f32 %v393_v34, %v136_v29  ;;  %v372_v47 = vadd.f32 %v371_v37, %v115_v32  ;;  %v556_v6 = vadd.f32 %v555_v60, %v293_v55  ;;  %v276_v29 = vld [vmem:[#allocation4 + $0x6e8] sm:$0xff]  ;;  %v298_v35 = vld [vmem:[#allocation4 + $0x798] sm:$0xff]  ;;  %v277_v37 = vld [vmem:[#allocation4 + $0x6f0] sm:$0xff] }
  0x6c   :  { %v419_v11 = vadd.f32 %v418_v2, %v160_v61  ;;  %v164_v32 = vld [vmem:[#allocation4 + $0x368] sm:$0xff]  ;;  %v278_v45 = vld [vmem:[#allocation4 + $0x6f8] sm:$0xff]  ;;  %v167_v55 = vld [vmem:[#allocation4 + $0x380] sm:$0xff] }
  0x6d   :  { %v531_v43 = vadd.f32 %v530_v33, %v269_v28  ;;  %v395_v54 = vadd.f32 %v394_v44, %v137_v39  ;;  %v373_v57 = vadd.f32 %v372_v47, %v116_v42  ;;  %v557_v15 = vadd.f32 %v556_v6, %v294_v1  ;;  %v300_v51 = vld [vmem:[#allocation4 + $0x7a8] sm:$0xff]  ;;  %v147_v60 = vld [vmem:[#allocation4 + $0x2e0] sm:$0xff] }
  0x6e   :  { %v420_v20 = vadd.f32 %v419_v11, %v161_v7  ;;  %v148_v2 = vld [vmem:[#allocation4 + $0x2e8] sm:$0xff]  ;;  %v303_v6 = vld [vmem:[#allocation4 + $0x7c0] sm:$0xff] }
  0x6f   :  { %v532_v53 = vadd.f32 %v531_v43, %v270_v38  ;;  %v396_v0 = vadd.f32 %v395_v54, %v138_v49  ;;  %v374_v3 = vadd.f32 %v373_v57, %v117_v52  ;;  %v558_v23 = vadd.f32 %v557_v15, %v295_v10  ;;  %v144_v38 = vld [vmem:[#allocation4 + $0x2c8] sm:$0xff]  ;;  %v299_v43 = vld [vmem:[#allocation4 + $0x7a0] sm:$0xff]  ;;  %v170_v10 = vld [vmem:[#allocation4 + $0x398] sm:$0xff] }
  0x70   :  { %v421_v28 = vadd.f32 %v420_v20, %v162_v16  ;;  %v171_v16 = vld [vmem:[#allocation4 + $0x3a0] sm:$0xff] }
  0x71   :  { %v533_v63 = vadd.f32 %v532_v53, %v271_v48  ;;  %v397_v9 = vadd.f32 %v396_v0, %v139_v59  ;;  %v375_v12 = vadd.f32 %v374_v3, %v118_v62  ;;  %v559_v31 = vadd.f32 %v558_v23, %v296_v19  ;;  %v166_v48 = vld [vmem:[#allocation4 + $0x378] sm:$0xff]  ;;  %v168_v62 = vld [vmem:[#allocation4 + $0x388] sm:$0xff] }
  0x72   :  { %v422_v36 = vadd.f32 %v421_v28, %v163_v24  ;;  %v146_v53 = vld [vmem:[#allocation4 + $0x2d8] sm:$0xff] }
  0x73   :  { %v534_v8 = vadd.f32 %v533_v63, %v272_v58  ;;  %v398_v18 = vadd.f32 %v397_v9, %v140_v5  ;;  %376 = vadd.xlane.f32.xlu0 %v375_v12  ;;  %v560_v39 = vadd.f32 %v559_v31, %v297_v27  ;;  %v301_v58 = vld [vmem:[#allocation4 + $0x7b0] sm:$0xff]  ;;  %v302_v0 = vld [vmem:[#allocation4 + $0x7b8] sm:$0xff]  ;;  %v304_v12 = vld [vmem:[#allocation4 + $0x7c8] sm:$0xff] }
  0x74   :  { %v423_v44 = vadd.f32 %v422_v36, %v164_v32  ;;  %v306_v23 = vld [vmem:[#allocation4 + $0x7d8] sm:$0xff]  ;;  %v307_v27 = vld [vmem:[#allocation4 + $0x7e0] sm:$0xff]  ;;  %v308_v31 = vld [vmem:[#allocation4 + $0x7e8] sm:$0xff] }
  0x75   :  { %v535_v17 = vadd.f32 %v534_v8, %v273_v4  ;;  %v399_v26 = vadd.f32 %v398_v18, %v141_v14  ;;  %v561_v47 = vadd.f32 %v560_v39, %v298_v35  ;;  %v169_v4 = vld [vmem:[#allocation4 + $0x390] sm:$0xff]  ;;  %v150_v14 = vld [vmem:[#allocation4 + $0x2f8] sm:$0xff] }
  0x76   :  { %v424_v52 = vadd.f32 %v423_v44, %v165_v40  ;;  %v149_v8 = vld [vmem:[#allocation4 + $0x2f0] sm:$0xff]  ;;  %v310_v39 = vld [vmem:[#allocation4 + $0x7f8] sm:$0xff] }
  0x77   :  { %v536_v25 = vadd.f32 %v535_v17, %v274_v13  ;;  %v400_v34 = vadd.f32 %v399_v26, %v142_v22  ;;  %v562_v54 = vadd.f32 %v561_v47, %v299_v43  ;;  %v305_v18 = vld [vmem:[#allocation4 + $0x7d0] sm:$0xff]  ;;  %v179_v47 = vld [vmem:[#allocation4 + $0x3e0] sm:$0xff] }
  0x78   :  { %v425_v59 = vadd.f32 %v424_v52, %v166_v48  ;;  %v173_v26 = vld [vmem:[#allocation4 + $0x3b0] sm:$0xff] }
  0x79   :  { %v537_v33 = vadd.f32 %v536_v25, %v275_v21  ;;  %v401_v42 = vadd.f32 %v400_v34, %v143_v30  ;;  %v563_v61 = vadd.f32 %v562_v54, %v300_v51  ;;  %v172_v21 = vld [vmem:[#allocation4 + $0x3a8] sm:$0xff]  ;;  %v174_v30 = vld [vmem:[#allocation4 + $0x3b8] sm:$0xff]  ;;  %v175_v34 = vld [vmem:[#allocation4 + $0x3c0] sm:$0xff] }
  0x7a   :  { %v426_v1 = vadd.f32 %v425_v59, %v167_v55  ;;  %v309_v35 = vld [vmem:[#allocation4 + $0x7f0] sm:$0xff]  ;;  %v646_v59 = vld [vmem:[#allocation6 + $0x28] sm:$0xff] }
  0x7b   :  { %v538_v41 = vadd.f32 %v537_v33, %v276_v29  ;;  %v402_v50 = vadd.f32 %v401_v42, %v144_v38  ;;  %v564_v3 = vadd.f32 %v563_v61, %v301_v58  ;;  %v176_v38 = vld [vmem:[#allocation4 + $0x3c8] sm:$0xff]  ;;  %v177_v42 = vld [vmem:[#allocation4 + $0x3d0] sm:$0xff]  ;;  %v644_v61 = vld [vmem:[#allocation6 + $0x18] sm:$0xff] }
  0x7c   :  { %v427_v7 = vadd.f32 %v426_v1, %v168_v62  ;;  %v181_v51 = vld [vmem:[#allocation4 + $0x3f0] sm:$0xff] }
  0x7d   :  { %v539_v49 = vadd.f32 %v538_v41, %v277_v37  ;;  %v403_v57 = vadd.f32 %v402_v50, %v145_v46  ;;  %v565_v9 = vadd.f32 %v564_v3, %v302_v0  ;;  %v647_v58 = vld [vmem:[#allocation6 + $0x30] sm:$0xff]  ;;  %v641_v0 = vld [vmem:[#allocation6] sm:$0xff] }
  0x7e   :  { %v428_v13 = vadd.f32 %v427_v7, %v169_v4  ;;  %v643_v62 = vld [vmem:[#allocation6 + $0x10] sm:$0xff] }
  0x7f   :  { %v540_v56 = vadd.f32 %v539_v49, %v278_v45  ;;  %v404_v63 = vadd.f32 %v403_v57, %v146_v53  ;;  %v566_v15 = vadd.f32 %v565_v9, %v303_v6  ;;  %v178_v45 = vld [vmem:[#allocation4 + $0x3d8] sm:$0xff]  ;;  %v180_v49 = vld [vmem:[#allocation4 + $0x3e8] sm:$0xff] }
  0x80   :  { %v429_v19 = vadd.f32 %v428_v13, %v170_v10  ;;  %v182_v53 = vld [vmem:[#allocation4 + $0x3f8] sm:$0xff] }
  0x81   :  { %541 = vadd.xlane.f32.xlu1 %v540_v56  ;;  %v405_v5 = vadd.f32 %v404_v63, %v147_v60  ;;  %v567_v20 = vadd.f32 %v566_v15, %v304_v12  ;;  %v826_v56 = vmov 0.0   ;;  %v648_v57 = vld [vmem:[#allocation6 + $0x38] sm:$0xff]  ;;  %v645_v60 = vld [vmem:[#allocation6 + $0x20] sm:$0xff]  ;;  %v642_v63 = vld [vmem:[#allocation6 + $0x8] sm:$0xff] }
  0x82   :  { %v430_v24 = vadd.f32 %v429_v19, %v171_v16  ;;  %54 = vst.msk [vmem:[#allocation2] sm:$0x3] %vm53_vm0, %v826_v56  ;;  %729 = vmatprep.mubr.f32.mxu0 %v826_v56  ;;  %689 = vmatprep.subr.mxu0 %v648_v57  ;;  %v759_v57 = vstv %s881_s4 }
  0x83   :  { %v406_v11 = vadd.f32 %v405_v5, %v148_v2  ;;  %v568_v25 = vadd.f32 %v567_v20, %v305_v18  ;;  %690 = vmatpush1.msra.mxu0 %v647_v58  ;;  %v584_v2 = vlaneseq }
  0x84   :  { %v431_v28 = vadd.f32 %v430_v24, %v172_v21  ;;  %691 = vmatprep.subr.mxu0 %v646_v59 }
  0x85   :  { %v407_v17 = vadd.f32 %v406_v11, %v149_v8  ;;  %v569_v29 = vadd.f32 %v568_v25, %v306_v23  ;;  %692 = vmatpush1.msra.mxu0 %v645_v60  ;;  %v585_v5 = vand.u32 127, %v584_v2  ;;  %v587_v10 = vshrl.u32 %v584_v2, 7 }
  0x86   :  { %v432_v32 = vadd.f32 %v431_v28, %v173_v26  ;;  %693 = vmatprep.subr.mxu0 %v644_v61 }
  0x87   :  { %v408_v22 = vadd.f32 %v407_v17, %v150_v14  ;;  %v570_v33 = vadd.f32 %v569_v29, %v307_v27  ;;  %694 = vmatpush1.msra.mxu0 %v643_v62  ;;  %v590_v6 = vadd.s32 4294967288, %v585_v5  ;;  %v597_v8 = vadd.s32 4294967280, %v585_v5 }
  0x88   :  { %v433_v36 = vadd.f32 %v432_v32, %v174_v30  ;;  %695 = vmatprep.subr.mxu0 %v642_v63  ;;  %v604_v11 = vadd.s32 4294967272, %v585_v5  ;;  %v588_v14 = vsub.s32 %v585_v5, %v587_v10 }
  0x89   :  { %409 = vadd.xlane.f32.xlu0 %v408_v22  ;;  %v571_v37 = vadd.f32 %v570_v33, %v308_v31  ;;  %696 = vmatpush1.msra.mxu0 %v641_v0  ;;  %v593_v12 = vsub.s32 %v590_v6, %v587_v10  ;;  %v600_v13 = vsub.s32 %v597_v8, %v587_v10  ;;  %v311_v32 = vld [vmem:[#allocation2] sm:$0x3] }
  0x8a   :  { %v434_v40 = vadd.f32 %v433_v36, %v175_v34  ;;  %v607_v15 = vsub.s32 %v604_v11, %v587_v10 }
  0x8b   :  { %v572_v41 = vadd.f32 %v571_v37, %v309_v35 }
  0x8c   :  { %v435_v43 = vadd.f32 %v434_v40, %v176_v38  ;;  %v653_v38 = vsub.s32 0, %v587_v10  ;;  %v657_v40 = vsub.s32 1, %v587_v10 }
  0x8d   :  { %v573_v44 = vadd.f32 %v572_v41, %v310_v39  ;;  %v649_v39 = vld [vmem:[%s879_s2] sm:$0x3] }
  0x8e   :  { %v436_v46 = vadd.f32 %v435_v43, %v177_v42  ;;  %v654_v41 = vrot.slane %v649_v39, %v653_v38  ;;  %v738_v42 = vld [vmem:[%s880_s3] sm:$0x3]  ;;  %v658_v43 = vrot.slane %v649_v39, %v657_v40 }
  0x8f   :  { %574 = vadd.xlane.f32.xlu1 %v573_v44 }
  0x90   :  { %v437_v48 = vadd.f32 %v436_v46, %v178_v45  ;;  %v743_v46 = vrot.slane %v738_v42, %v653_v38 }
  0x92   :  { %v438_v50 = vadd.f32 %v437_v48, %v179_v47 }
  0x94   :  { %v439_v52 = vadd.f32 %v438_v50, %v180_v49  ;;  %v747_v50 = vrot.slane %v738_v42, %v657_v40 }
  0x96   :  { %v440_v54 = vadd.f32 %v439_v52, %v181_v51 }
  0x98   :  { %v441_v55 = vadd.f32 %v440_v54, %v182_v53 }
  0x9a   :  { %442 = vadd.xlane.f32.xlu0 %v441_v55 }
  0xe4   :  { %v476_v1 = vpop.xlane.xlu1 %475 }
  0xe5   :  { %v614_v20 = vrot.slane %v476_v1, %v588_v14 }
  0xe7   :  { %v344_v3 = vpop.xlane.xlu0 %343 }
  0xe8   :  { %v589_v24 = vrot.slane %v344_v3, %v588_v14 }
  0xf1   :  { %v509_v4 = vpop.xlane.xlu1 %508 }
  0xf2   :  { %v618_v18 = vrot.slane %v509_v4, %v593_v12 }
  0xf4   :  { %v619_v25 = vsel %vm595_vm1, %v618_v18, %v614_v20 }
  0xfc   :  { %v377_v7 = vpop.xlane.xlu0 %376 }
  0xfd   :  { %v594_v21 = vrot.slane %v377_v7, %v593_v12 }
  0xff   :  { %v596_v28 = vsel %vm595_vm1, %v594_v21, %v589_v24 }
 0x10a   :  { %v542_v9 = vpop.xlane.xlu1 %541 }
 0x10b   :  { %v623_v19 = vrot.slane %v542_v9, %v600_v13 }
 0x10d   :  { %v624_v26 = vsel %vm602_vm2, %v623_v19, %v619_v25 }
 0x112   :  { %v410_v16 = vpop.xlane.xlu0 %409 }
 0x113   :  { %v601_v23 = vrot.slane %v410_v16, %v600_v13 }
 0x115   :  { %v603_v31 = vsel %vm602_vm2, %v601_v23, %v596_v28 }
 0x118   :  { %v575_v17 = vpop.xlane.xlu1 %574 }
 0x119   :  { %v628_v22 = vrot.slane %v575_v17, %v607_v15 }
 0x11b   :  { %v629_v29 = vsel %vm609_vm3, %v628_v22, %v624_v26 }
 0x123   :  { %v443_v27 = vpop.xlane.xlu0 %442 }
 0x124   :  { %v608_v30 = vrot.slane %v443_v27, %v607_v15 }
 0x126   :  { %v610_v33 = vsel %vm609_vm3, %v608_v30, %v603_v31 }
 0x127   :  { %v631_v34 = vsel %vm630_vm4, %v629_v29, %v610_v33 }
 0x128   :  { %v633_v35 = vadd.f32 %v631_v34, %v311_v32 }
 0x12a   :  { %635 = vst.msk [vmem:[#allocation2] sm:$0x3] %vm53_vm0, %v633_v35 }
 0x131   :  { %v639_v36 = vld [vmem:[#allocation2] sm:$0x3] }
 0x132   :  { %v640_v37 = vmul.f32 0.00024414063, %v639_v36 }
 0x134   :  { %770 = vmatmul.mubr.msk.f32.vlgmr.msra.gmra.mxu0 %vm661_vm5, %v640_v37 }
 0x1f4   :  { %v731_v44 = vpop.f32.mrf.mxu0 }
 0x1f5   :  { %v732_v45 = vadd.f32 %v731_v44, %v654_v41 }
 0x1f6   :  { %v733_v47 = vpop.f32.mrf.mxu0 }
 0x1f7   :  { %v736_v48 = vmax.f32 %v732_v45, 0.0  ;;  %v734_v49 = vadd.f32 %v733_v47, %v658_v43 }
 0x1f9   :  { %v750_v51 = vmul.f32 %v743_v46, %v736_v48  ;;  %v737_v52 = vmax.f32 %v734_v49, 0.0 }
 0x1fb   :  { %v751_v53 = vmul.f32 %v747_v50, %v737_v52  ;;  %v753_v54 = vsel %vm752_vm6, %v750_v51, 0.0 }
 0x1fd   :  { %v754_v55 = vsel %vm752_vm6, %v751_v53, 0.0 }
 0x1fe   :  { %v755_v56 = vadd.f32 %v754_v55, %v753_v54 }
 0x200   :  { %756 = vadd.xlane.f32.xlu0 %v755_v56 }
 0x289   :  { %v757_v58 = vpop.xlane.xlu0 %756 }
 0x28a   :  { %v760_v59 = vadd.f32 %v759_v57, %v757_v58 }
 0x28c   :  { %v761_v60 = vand.u32 2147483647, %v760_v59 }
 0x28e   :  { %763 = vst.msk [vmem:[%s882_s5] sm:$0x3] %vm762_vm7, %v761_v60 }
 0x28f   :  { %768 = vsyncpa [#allocation5], 1 }
 0x290   :  { %769 = vsyncpa [#allocation7], 1 }

</bundles_post_ra>
